<compile_context>
chip_gen: v7x
topology: tpu7x:2x2x1
jax: 0.10.0
libtpu: 0.0.40
codegen_flags: <defaults>
</compile_context>

<pallas_src>
import functools

import jax
import jax.numpy as jnp
from jax import lax
from jax.experimental import pallas as pl
from jax.experimental.pallas import tpu as pltpu

_LANE = 128
_VMEM_LIMIT = 32 << 20               # explicit scoped-VMEM budget (safe on v5e/v6e/v7x)
_FUSED_PIPE_BUDGET = 24 << 20        # max pipeline footprint for the single-pass path
_SPATIAL_TILE_TARGET_BYTES = 4 << 20 # per-block byte target for the streaming path
_MAX_SPATIAL_TILE = 4096             # keeps the in-kernel chunk loop short


def _round_up(n, m):
    return ((n + m - 1) // m) * m


def _spatial_tile(hwp, c, itemsize):
    """Largest multiple-of-128 divisor of hwp under the per-block byte / lane caps."""
    cap = max(_LANE, min(_MAX_SPATIAL_TILE,
                         (_SPATIAL_TILE_TARGET_BYTES // max(c * itemsize, 1))
                         // _LANE * _LANE))
    m = hwp // _LANE
    best = 1
    for d in range(1, min(m, cap // _LANE) + 1):
        if m % d == 0:
            best = d
    return best * _LANE


def _gates_from_pooled(pooled_col, w1t, w2t):
    """sigmoid(relu(pooled @ W1) @ W2), with pooled held as a (C, 1) column."""
    h = jnp.maximum(
        jnp.dot(w1t, pooled_col, preferred_element_type=jnp.float32), 0.0)   # (Cr, 1)
    return jax.nn.sigmoid(
        jnp.dot(w2t, h, preferred_element_type=jnp.float32))                 # (C, 1)


def _lane_partial_sum(x_ref, n_chunks):
    """Sum the 128-wide lane chunks of x_ref[0] (shape (C, n_chunks*128)) into a (C, 128)
    f32 partial -- pure VPU adds; the single cross-lane reduce is deferred to the caller."""
    def chunk(t):
        off = pl.multiple_of(t * _LANE, _LANE)
        return x_ref[0, :, pl.ds(off, _LANE)].astype(jnp.float32)

    if n_chunks <= 16:                       # short: fully unrolled static slices
        acc = chunk(0)
        for t in range(1, n_chunks):
            acc = acc + chunk(t)
        return acc
    return lax.fori_loop(1, n_chunks, lambda t, a: a + chunk(t), chunk(0))


def _fused_kernel(x_ref, w1t_ref, w2t_ref, o_ref, *, inv_hw, n_chunks):
    """Single pass per batch: pool, gate and rescale from the VMEM-resident x block."""
    acc = _lane_partial_sum(x_ref, n_chunks)                        # (C, 128) f32
    pooled = jnp.sum(acc, axis=1, keepdims=True) * inv_hw           # (C, 1), one XLU reduce
    g = _gates_from_pooled(pooled, w1t_ref[...], w2t_ref[...])      # (C, 1) f32
    o_ref[0] = (x_ref[0].astype(jnp.float32) * g).astype(o_ref.dtype)


def _pool_gate_kernel(x_ref, w1t_ref, w2t_ref, g_ref, acc_ref, *, inv_hw, n_chunks):
    """Streaming pool over spatial tiles; FC fused into the finalize of the last tile."""
    j = pl.program_id(1)

    @pl.when(j == 0)
    def _():
        acc_ref[...] = jnp.zeros_like(acc_ref)

    acc_ref[...] += _lane_partial_sum(x_ref, n_chunks)

    @pl.when(j == pl.num_programs(1) - 1)
    def _():
        pooled = jnp.sum(acc_ref[...], axis=1, keepdims=True) * inv_hw     # (C, 1)
        g_ref[0] = _gates_from_pooled(pooled, w1t_ref[...], w2t_ref[...])


def _scale_kernel(x_ref, g_ref, o_ref):
    """out = x * gate; the (1, C, 1) gate block broadcasts over the spatial lanes."""
    o_ref[...] = (x_ref[...].astype(jnp.float32) * g_ref[...]).astype(o_ref.dtype)


@functools.partial(jax.jit, static_argnames=("force_streaming",))
def se_layer(x_nchw, w1, w2, *, force_streaming=False):
    """SELayer.forward (NCHW in / NCHW out). w1: (C, C//r), w2: (C//r, C) so y = x @ w."""
    b, c, h, w = x_nchw.shape
    hw = h * w
    cr = w1.shape[1]
    assert w1.shape == (c, cr) and w2.shape == (cr, c)

    # Transposed weights so the gate MLP works on (C, 1) columns without in-kernel
    # transposes: gates = sigmoid(w2t @ relu(w1t @ pooled)).
    w1t = jnp.asarray(w1, jnp.float32).T      # (Cr, C)
    w2t = jnp.asarray(w2, jnp.float32).T      # (C, Cr)

    x3 = x_nchw.reshape(b, c, hw)             # contiguous NCHW flatten, no transpose
    hwp = _round_up(hw, _LANE)
    if hwp != hw:                             # lane-dense padding; zeros don't affect sums
        x3 = jnp.pad(x3, ((0, 0), (0, 0), (0, hwp - hw)))

    itemsize = x3.dtype.itemsize
    inv_hw = 1.0 / float(hw)
    block_bytes = c * hwp * itemsize

    def _cp(sem):
        return pltpu.CompilerParams(dimension_semantics=sem,
                                    vmem_limit_bytes=_VMEM_LIMIT)

    # NOTE: the parallel axis is the batch; with B == 1 only one v7x TensorCore pools,
    # but the (HBM-bound) rescale pass always parallelizes over spatial tiles too.
    if (not force_streaming) and 4 * block_bytes + (1 << 20) <= _FUSED_PIPE_BUDGET:
        # ---- fully fused single-pass path: read x once, write once (2N HBM traffic) ----
        out3 = pl.pallas_call(
            functools.partial(_fused_kernel, inv_hw=inv_hw, n_chunks=hwp // _LANE),
            out_shape=jax.ShapeDtypeStruct((b, c, hwp), x3.dtype),
            grid_spec=pltpu.PrefetchScalarGridSpec(
                num_scalar_prefetch=0,
                grid=(b,),
                in_specs=[
                    pl.BlockSpec((1, c, hwp), lambda bi: (bi, 0, 0)),
                    pl.BlockSpec((cr, c), lambda bi: (0, 0)),
                    pl.BlockSpec((c, cr), lambda bi: (0, 0)),
                ],
                out_specs=pl.BlockSpec((1, c, hwp), lambda bi: (bi, 0, 0)),
            ),
            compiler_params=_cp(("parallel",)),
        )(x3, w1t, w2t)
    else:
        # ---- streaming path: pool+gate kernel, then rescale kernel (3N HBM traffic) ----
        thw = _spatial_tile(hwp, c, itemsize)
        n_sp = hwp // thw
        grid = (b, n_sp)

        gates = pl.pallas_call(
            functools.partial(_pool_gate_kernel, inv_hw=inv_hw, n_chunks=thw // _LANE),
            out_shape=jax.ShapeDtypeStruct((b, c, 1), jnp.float32),
            grid_spec=pltpu.PrefetchScalarGridSpec(
                num_scalar_prefetch=0,
                grid=grid,
                in_specs=[
                    pl.BlockSpec((1, c, thw), lambda bi, j: (bi, 0, j)),
                    pl.BlockSpec((cr, c), lambda bi, j: (0, 0)),
                    pl.BlockSpec((c, cr), lambda bi, j: (0, 0)),
                ],
                out_specs=pl.BlockSpec((1, c, 1), lambda bi, j: (bi, 0, 0)),
                scratch_shapes=[pltpu.VMEM((c, _LANE), jnp.float32)],
            ),
            compiler_params=_cp(("parallel", "arbitrary")),
        )(x3, w1t, w2t)

        out3 = pl.pallas_call(
            _scale_kernel,
            out_shape=jax.ShapeDtypeStruct((b, c, hwp), x3.dtype),
            grid_spec=pltpu.PrefetchScalarGridSpec(
                num_scalar_prefetch=0,
                grid=grid,
                in_specs=[
                    pl.BlockSpec((1, c, thw), lambda bi, j: (bi, 0, j)),
                    pl.BlockSpec((1, c, 1), lambda bi, j: (bi, 0, 0)),
                ],
                out_specs=pl.BlockSpec((1, c, thw), lambda bi, j: (bi, 0, j)),
            ),
            compiler_params=_cp(("parallel", "parallel")),
        )(x3, gates)

    if hwp != hw:
        out3 = out3[:, :, :hw]
    return out3.reshape(b, c, h, w)


if __name__ == "__main__":
    reduction = 16

    def reference(x, w1, w2):
        pooled = jnp.mean(x, axis=(2, 3))
        gates = jax.nn.sigmoid(jnp.maximum(pooled @ w1, 0.0) @ w2)
        return x * gates[:, :, None, None]

    key = jax.random.PRNGKey(0)
    # Second case (7x7) exercises the lane-padding path for small feature maps.
    for (B, C, H, W) in [(2, 32, 16, 16), (2, 32, 7, 7)]:
        CR = max(C // reduction, 1)
        key, kx, k1, k2 = jax.random.split(key, 4)
        x = jax.random.normal(kx, (B, C, H, W), jnp.float32)         # NCHW, like PyTorch
        # nn.Linear weights stored transposed as (in, out) so y = x @ w (bias-free).
        w1 = jax.random.normal(k1, (C, CR), jnp.float32) * 0.2
        w2 = jax.random.normal(k2, (CR, C), jnp.float32) * 0.2
        ref = reference(x, w1, w2)

        for streaming in (False, True):   # validate both the fused and streaming paths
            out = jax.block_until_ready(
                se_layer(x, w1, w2, force_streaming=streaming))
            assert out.shape == x.shape and out.dtype == x.dtype
            err = float(jnp.max(jnp.abs(out - ref)))
            assert err < 1e-5, (
                f"mismatch shape={(B, C, H, W)} streaming={streaming}: {err}")

    print("KERNEL_OK")
</pallas_src>

<mosaic_0001>
module attributes {stable_mosaic.version = 11 : i64} {
  func.func @_fused_kernel(%arg0: i32, %arg1: memref<1x32x256xf32, #tpu.memory_space<vmem>>, %arg2: memref<2x32xf32, #tpu.memory_space<vmem>>, %arg3: memref<32x2xf32, #tpu.memory_space<vmem>>, %arg4: memref<1x32x256xf32, #tpu.memory_space<vmem>>) attributes {dimension_semantics = [#tpu.dimension_semantics<parallel>], iteration_bounds = array<i64: 2>, scalar_prefetch = 0 : i64, scratch_operands = 0 : i64, tpu.core_type = #tpu.core_type<tc>, window_params = [{transform_indices = @transform_0, window_bounds = array<i64: 1, 32, 256>}, {pipeline_mode = #tpu.pipeline_mode<synchronous>, transform_indices = @transform_1, window_bounds = array<i64: 2, 32>}, {pipeline_mode = #tpu.pipeline_mode<synchronous>, transform_indices = @transform_2, window_bounds = array<i64: 32, 2>}, {transform_indices = @transform_3, window_bounds = array<i64: 1, 32, 256>}]} {
    %c0_i32 = arith.constant 0 : i32
    %0 = tpu.assume_multiple %c0_i32, 128 : i32
    %c0 = arith.constant 0 : index
    %c0_0 = arith.constant 0 : index
    %1 = arith.index_cast %0 : i32 to index
    %2 = vector.load %arg1[%c0, %c0_0, %1] : memref<1x32x256xf32, #tpu.memory_space<vmem>>, vector<1x32x128xf32>
    %3 = vector.shape_cast %2 : vector<1x32x128xf32> to vector<32x128xf32>
    %c128_i32 = arith.constant 128 : i32
    %4 = tpu.assume_multiple %c128_i32, 128 : i32
    %c0_1 = arith.constant 0 : index
    %c0_2 = arith.constant 0 : index
    %5 = arith.index_cast %4 : i32 to index
    %6 = vector.load %arg1[%c0_1, %c0_2, %5] : memref<1x32x256xf32, #tpu.memory_space<vmem>>, vector<1x32x128xf32>
    %7 = vector.shape_cast %6 : vector<1x32x128xf32> to vector<32x128xf32>
    %8 = arith.addf %3, %7 : vector<32x128xf32>
    %cst = arith.constant dense<0.000000e+00> : vector<32xf32>
    %9 = vector.multi_reduction <add>, %8, %cst [1] : vector<32x128xf32> to vector<32xf32>
    %10 = vector.shape_cast %9 : vector<32xf32> to vector<32x1xf32>
    %cst_3 = arith.constant 3.906250e-03 : f32
    %11 = vector.broadcast %cst_3 : f32 to vector<32x1xf32>
    %12 = arith.mulf %10, %11 : vector<32x1xf32>
    %c0_4 = arith.constant 0 : index
    %c0_5 = arith.constant 0 : index
    %13 = vector.load %arg2[%c0_4, %c0_5] : memref<2x32xf32, #tpu.memory_space<vmem>>, vector<2x32xf32>
    %c0_6 = arith.constant 0 : index
    %c0_7 = arith.constant 0 : index
    %14 = vector.load %arg3[%c0_6, %c0_7] : memref<32x2xf32, #tpu.memory_space<vmem>>, vector<32x2xf32>
    %cst_8 = arith.constant dense<0.000000e+00> : vector<2x1xf32>
    %15 = tpu.matmul %13, %12, %cst_8 {dimension_numbers = #tpu.dot_dimension_numbers<[1], [0], [0], [1], [0, 0, 1, 1], [], []>} : vector<2x32xf32>, vector<32x1xf32>, vector<2x1xf32> -> vector<2x1xf32>
    %cst_9 = arith.constant 0.000000e+00 : f32
    %16 = vector.broadcast %cst_9 : f32 to vector<2x1xf32>
    %17 = arith.maximumf %15, %16 : vector<2x1xf32>
    %cst_10 = arith.constant dense<0.000000e+00> : vector<32x1xf32>
    %18 = tpu.matmul %14, %17, %cst_10 {dimension_numbers = #tpu.dot_dimension_numbers<[1], [0], [0], [1], [0, 0, 1, 1], [], []>} : vector<32x2xf32>, vector<2x1xf32>, vector<32x1xf32> -> vector<32x1xf32>
    %19 = arith.negf %18 : vector<32x1xf32>
    %20 = math.exp %19 : vector<32x1xf32>
    %cst_11 = arith.constant 1.000000e+00 : f32
    %21 = vector.broadcast %cst_11 : f32 to vector<32x1xf32>
    %22 = arith.addf %21, %20 : vector<32x1xf32>
    %23 = arith.divf %21, %22 : vector<32x1xf32>
    %c0_12 = arith.constant 0 : index
    %c0_13 = arith.constant 0 : index
    %c0_14 = arith.constant 0 : index
    %24 = vector.load %arg1[%c0_12, %c0_13, %c0_14] : memref<1x32x256xf32, #tpu.memory_space<vmem>>, vector<1x32x256xf32>
    %25 = vector.shape_cast %24 : vector<1x32x256xf32> to vector<32x256xf32>
    %26 = vector.broadcast %23 : vector<32x1xf32> to vector<32x256xf32>
    %27 = arith.mulf %25, %26 : vector<32x256xf32>
    %c0_15 = arith.constant 0 : index
    %c0_16 = arith.constant 0 : index
    %c0_17 = arith.constant 0 : index
    %28 = vector.load %arg4[%c0_15, %c0_16, %c0_17] : memref<1x32x256xf32, #tpu.memory_space<vmem>>, vector<1x32x256xf32>
    %29 = vector.shape_cast %28 : vector<1x32x256xf32> to vector<32x256xf32>
    %30 = vector.shape_cast %27 : vector<32x256xf32> to vector<1x32x256xf32>
    tpu.vector_store %arg4[%c0_15, %c0_16, %c0_17], %30 {strides = array<i32>} : memref<1x32x256xf32, #tpu.memory_space<vmem>>, vector<1x32x256xf32>,
    return
  }
  func.func @transform_0(%arg0: i32) -> (i32, i32, i32) {
    %c0_i32 = arith.constant 0 : i32
    %c0_i32_0 = arith.constant 0 : i32
    %c0_i32_1 = arith.constant 0 : i32
    return %arg0, %c0_i32, %c0_i32_0 : i32, i32, i32
  }
  func.func @transform_1(%arg0: i32) -> (i32, i32) {
    %c0_i32 = arith.constant 0 : i32
    %c0_i32_0 = arith.constant 0 : i32
    %c0_i32_1 = arith.constant 0 : i32
    return %c0_i32, %c0_i32_0 : i32, i32
  }
  func.func @transform_2(%arg0: i32) -> (i32, i32) {
    %c0_i32 = arith.constant 0 : i32
    %c0_i32_0 = arith.constant 0 : i32
    %c0_i32_1 = arith.constant 0 : i32
    return %c0_i32, %c0_i32_0 : i32, i32
  }
  func.func @transform_3(%arg0: i32) -> (i32, i32, i32) {
    %c0_i32 = arith.constant 0 : i32
    %c0_i32_0 = arith.constant 0 : i32
    %c0_i32_1 = arith.constant 0 : i32
    return %arg0, %c0_i32, %c0_i32_0 : i32, i32, i32
  }
}

</mosaic_0001>

<bundles_post_ra>
// kernel: se_layer.1
= control target key start
LH: loop header
LB: loop body
LE: loop exit
PB: predicated region body
PF: predicated region fallthrough
CT: control target
= control target key end

     0   :  { %s625_s12 = smov 0   ;;  %s696_s0 = inlined_call_operand.vmem [shape: f32[2,32,256], index: 0, kind: input, shape index: {}]   ;;  %s697_s1 = inlined_call_operand.vmem [shape: f32[2,32], index: 1, kind: input, shape index: {}]   ;;  %s698_s2 = inlined_call_operand.vmem [shape: f32[32,2], index: 2, kind: input, shape index: {}]   ;;  %s699_s3 = inlined_call_operand.vmem [shape: f32[2,32,256], index: 3, kind: output, shape index: {}]  }
   0x1 LB: > { %s501_s13 = sadd.s32 4294967295, %s599_s12   ;;  %p505_p0 = scmp.ge.s32.totalorder %s599_s12, 1  ;;  %s599_s12 = sphi %s625_s12, %s13_s12  }
   0x2   : > { %p137_p1 = scmp.lt.s32.totalorder %s599_s12, 3 }
   0x4   : > { %p138_p2 = pnand %p505_p0, %p137_p1 }
   0x5   : > { %p161_p3 = scmp.lt.s32.totalorder (!%p138_p2), %s501_s13, 1  ;;  %v601_v12 = vmov (!%p138_p2), 0.0|0.0   ;;  %vm602_vm0 = vmmov (!%p138_p2), 0   ;;  %v603_v13 = vmov (!%p138_p2), 0.0   ;;  %v196_v24 = vld [vmem:[%s697_s1] sm:$0x3] (!%p138_p2) }
   0x6   : > { %141 = sbr.rel (%p138_p2) target bundleno = 771 (0x303), region = 32  ;;  %557 = vmatprep.subr.bf16.mxu0 (!%p138_p2), %v601_v12  ;;  %546 = vmatprep.mubr.msk.f32.mxu0 (!%p138_p2), %vm602_vm0, %v603_v13  ;;  %vm201_vm1 = vcmask (!%p138_p2), 261120   ;;  %v197_v25 = vld [vmem:[%s698_s2] sm:$0xff] (!%p138_p2)  ;;  %vm276_vm2 = vcmask (!%p138_p2), 15360   ;;  %vm289_vm3 = vcmask (!%p138_p2), 1041408   ;;  %v198_v29 = vld [vmem:[%s698_s2 + $0x8] sm:$0xff] (!%p138_p2) }
   0x7   : > { %551 = vmatprep.mubr.msk.f32.mxu1 (!%p138_p2), %vm276_vm2, %v197_v25  ;;  %v199_v30 = vld [vmem:[%s698_s2 + $0x10] sm:$0xff] (!%p138_p2)  ;;  %v200_v31 = vld [vmem:[%s698_s2 + $0x18] sm:$0xff] (!%p138_p2)  ;;  %v604_v32 = vmov (!%p138_p2), 0  }
   0x8   : > { %576 = vset.pattern.permute.xlu1 (!%p138_p2), %v604_v32  ;;  %575 = vset.pattern.permute.xlu0 (!%p138_p2), %v604_v32 }
   0xd   : > { %s701_s13 = smov (!%p161_p3, %s501_s13), 1 }
   0xe   : > { %s526_s14 = sshll.u32 %s701_s13, 6 }
   0xf   : > { %s165_s17 = scalar_lea.vmem %s696_s0, %s526_s14  ;;  %s170_s30 = scalar_lea.vmem %s699_s3, %s526_s14 }
  0x10   : > { %v641_v0 = vld [vmem:[%s165_s17 + $0x20] sm:$0xff]  ;;  %v643_v1 = vld [vmem:[%s165_s17 + $0x28] sm:$0xff]  ;;  %v651_v5 = vld [vmem:[%s165_s17 + $0x30] sm:$0xff] }
  0x11   : > { %v645_v2 = vld [vmem:[%s165_s17] sm:$0xff]  ;;  %v182_v3 = vadd.f32 %v643_v1, %v641_v0  ;;  %v649_v4 = vld [vmem:[%s165_s17 + $0x8] sm:$0xff]  ;;  %v653_v6 = vld [vmem:[%s165_s17 + $0x38] sm:$0xff] }
  0x12   : > { %v180_v7 = vadd.f32 %v649_v4, %v645_v2  ;;  %v657_v8 = vld [vmem:[%s165_s17 + $0x10] sm:$0xff]  ;;  %v659_v9 = vld [vmem:[%s165_s17 + $0x18] sm:$0xff]  ;;  %v183_v10 = vadd.f32 %v653_v6, %v651_v5 }
  0x13   : > { %188 = vadd.xlane.f32.xlu1 %v182_v3  ;;  %v181_v11 = vadd.f32 %v659_v9, %v657_v8 }
  0x14   : > { %184 = vadd.xlane.f32.xlu0 %v180_v7 }
  0x17   : > { %190 = vadd.xlane.f32.xlu1 %v183_v10 }
  0x18   : > { %186 = vadd.xlane.f32.xlu0 %v181_v11 }
  0xa0   : > { %v189_v14 = vpop.xlane.xlu1 %188 }
  0xa1   : > { %v185_v15 = vpop.xlane.xlu0 %184  ;;  %v194_v20 = vmul.f32 0.00390625, %v189_v14 }
  0xa2   : > { %v192_v18 = vmul.f32 0.00390625, %v185_v15 }
  0xa4   : > { %v191_v16 = vpop.xlane.xlu1 %190 }
  0xa5   : > { %v187_v17 = vpop.xlane.xlu0 %186  ;;  %v195_v21 = vmul.f32 0.00390625, %v191_v16 }
  0xa6   : > { %v193_v19 = vmul.f32 0.00390625, %v187_v17 }
  0xa7   : > { %v561_v23 = vpack.c.bf16 %v195_v21, %v194_v20 }
  0xa8   : > { %v558_v22 = vpack.c.bf16 %v193_v19, %v192_v18 }
  0xaa   : > { %559 = vmatpush3.bf16.msra.mxu0 %v558_v22 }
  0xab   : > { %560 = vmatprep.subr.bf16.mxu0 %v601_v12 }
  0xae   : > { %562 = vmatpush3.bf16.msra.mxu0 %v561_v23 }
  0xb1   : > { %547 = vmatmul.mubr.msk.f32.vlgmr.msra.gmra.mrb[0].mxu0 %vm201_vm1, %v196_v24 }
 0x184   : > { %v271_v26 = vpop.f32.mrb[0].mxu0 }
 0x185   : > { %v275_v27 = vmax.f32 %v271_v26, 0.0  ;;  %v548_v28 = vpop.f32.mrb[1].mxu0 }
 0x187   : > { %549 = vmatprep.subr.msk.mxu1 %vm289_vm3, %v275_v27 }
 0x188   : > { %550 = vmatpush3.msk.msra.mxu1 %vm289_vm3, %v275_v27 }
 0x189   : > { %552 = vmatmul.mubr.msk.f32.vlgmr.msra.gmra.mrb[0].mxu1 %vm276_vm2, %v198_v29 }
 0x18a   : > { %554 = vmatprep.mubr.msk.f32.mxu1 %vm276_vm2, %v199_v30 }
 0x18d   : > { %555 = vmatmul.mubr.msk.f32.gmra.mrb[2].mxu1 %vm276_vm2, %v200_v31 }
 0x25c   : > { %v553_v33 = vpop.f32.mrb[0].mxu1 }
 0x25d   : > { %v521_v34 = vmul.f32 -1.442695, %v553_v33  ;;  %v359_v35 = vpop.f32.mrb[1].mxu1 }
 0x25e   : > { %v520_v36 = vmul.f32 -1.442695, %v359_v35 }
 0x25f   : > { %577 = vpow2.f32 %v521_v34 }
 0x260   : > { %579 = vpow2.f32 %v520_v36  ;;  %v556_v37 = vpop.f32.mrb[2].mxu1 }
 0x261   : > { %v523_v38 = vmul.f32 -1.442695, %v556_v37  ;;  %v369_v39 = vpop.f32.mrb[3].mxu1 }
 0x262   : > { %v522_v40 = vmul.f32 -1.442695, %v369_v39 }
 0x263   : > { %581 = vpow2.f32 %v523_v38 }
 0x264   : > { %583 = vpow2.f32 %v522_v40 }
 0x269   : > { %v578_v41 = vpop.eup %577 }
 0x26a   : > { %v580_v42 = vpop.eup %579  ;;  %v391_v43 = vadd.f32 1.0, %v578_v41 }
 0x26b   : > { %v390_v44 = vadd.f32 1.0, %v580_v42 }
 0x26c   : > { %585 = vrcp.f32 %v391_v43 }
 0x26d   : > { %v582_v45 = vpop.eup %581  ;;  %587 = vrcp.f32 %v390_v44 }
 0x26e   : > { %v584_v46 = vpop.eup %583  ;;  %v393_v48 = vadd.f32 1.0, %v582_v45 }
 0x26f   : > { %v392_v47 = vadd.f32 1.0, %v584_v46 }
 0x271   : > { %589 = vrcp.f32 %v392_v47 }
 0x272   : > { %591 = vrcp.f32 %v393_v48 }
 0x276   : > { %v586_v49 = vpop.eup %585 }
 0x277   : > { %v588_v50 = vpop.eup %587  ;;  %417 = vperm.xlu1 %576, %v586_v49  }
 0x278   : > { %412 = vperm.xlu0 %575, %v588_v50  }
 0x27b   : > { %v590_v51 = vpop.eup %589 }
 0x27c   : > { %422 = vperm.xlu1 %576, %v590_v51   ;;  %v592_v52 = vpop.eup %591 }
 0x280   : > { %427 = vperm.xlu1 %576, %v592_v52  }
 0x2f6   : > { %v418_v53 = vpop.permute.xlu1 %417 }
 0x2f7   : > { %v432_v54 = vmul.f32 %v418_v53, %v657_v8  ;;  %v433_v55 = vmul.f32 %v659_v9, %v418_v53  ;;  %v413_v56 = vpop.permute.xlu0 %412 }
 0x2f8   : > { %v430_v57 = vmul.f32 %v413_v56, %v645_v2  ;;  %v431_v58 = vmul.f32 %v649_v4, %v413_v56 }
 0x2f9   : > { %440 = vst [vmem:[%s170_s30 + $0x10] sm:$0xff] %v432_v54  ;;  %441 = vst [vmem:[%s170_s30 + $0x18] sm:$0xff] %v433_v55 }
 0x2fa   : > { %438 = vst [vmem:[%s170_s30] sm:$0xff] %v430_v57  ;;  %439 = vst [vmem:[%s170_s30 + $0x8] sm:$0xff] %v431_v58 }
 0x2fb   : > { %v423_v59 = vpop.permute.xlu1 %422 }
 0x2fc   : > { %v434_v60 = vmul.f32 %v423_v59, %v641_v0  ;;  %v435_v61 = vmul.f32 %v643_v1, %v423_v59 }
 0x2fe   : > { %442 = vst [vmem:[%s170_s30 + $0x20] sm:$0xff] %v434_v60  ;;  %443 = vst [vmem:[%s170_s30 + $0x28] sm:$0xff] %v435_v61 }
 0x2ff   : > { %v428_v62 = vpop.permute.xlu1 %427 }
 0x300   : > { %v436_v63 = vmul.f32 %v428_v62, %v651_v5  ;;  %v437_v3 = vmul.f32 %v653_v6, %v428_v62 }
 0x302   : > { %444 = vst [vmem:[%s170_s30 + $0x30] sm:$0xff] %v436_v63  ;;  %445 = vst [vmem:[%s170_s30 + $0x38] sm:$0xff] %v437_v3 }
 0x303 PF: > { %s13_s12 = sadd.s32 1, %s599_s12  }
 0x304   : > { %p10_p4 = scmp.ge.s32.totalorder %s13_s12, 4  }
 0x306   :  { %12 = sbr.rel (!%p10_p4) target bundleno = 1 (0x1), region = 63 }

</bundles_post_ra>
